<compile_context>
chip_gen: v7x
topology: tpu7x:2x2x1
jax: 0.10.0
libtpu: 0.0.40
codegen_flags: <defaults>
</compile_context>

<pallas_src>
import functools

import numpy as np

import jax
import jax.numpy as jnp
from jax.experimental import pallas as pl
from jax.experimental.pallas import tpu as pltpu

_BN_EPS = 1e-5
_MS_EPS = 1e-6
_VMEM_LIMIT = 32 * 1024 * 1024   # scoped-VMEM safe on v5e/v6e/v7x
_FULL_K_BYTES = 8 * 1024 * 1024  # budget for a single full-depth K step (bf16 tiles)


def _round_up(x, m):
    return ((x + m - 1) // m) * m


def _pick_tile_sublane(d):
    """Row (second-to-last) tile: multiple of 8 that divides d, else full d."""
    for t in (256, 128, 64, 32, 16, 8):
        if d % t == 0:
            return t
    return d


def _pick_tile_lane(d):
    """Lane (last) tile: 256/128 when they divide d, else full d (lane-dense)."""
    for t in (256, 128):
        if d % t == 0:
            return t
    return d


# ---------------------------------------------------------------------------
# Pallas kernels
# ---------------------------------------------------------------------------
def _matmul_fused_kernel(x_ref, w_ref, shift_ref, *rest,
                         apply_relu: bool, has_residual: bool, multi_k: bool):
    """(x @ w) + shift [+ residual] [+ ReLU]; bf16 operands, f32 accumulation."""
    if multi_k:
        if has_residual:
            res_ref, o_ref, acc_ref = rest
        else:
            o_ref, acc_ref = rest

        @pl.when(pl.program_id(2) == 0)
        def _():
            acc_ref[...] = jnp.zeros_like(acc_ref)

        acc_ref[...] += jnp.dot(x_ref[...], w_ref[...],
                                preferred_element_type=jnp.float32)

        @pl.when(pl.program_id(2) == pl.num_programs(2) - 1)
        def _():
            out = acc_ref[...] + shift_ref[...]
            if has_residual:
                out = out + res_ref[...].astype(jnp.float32)
            if apply_relu:
                out = jnp.maximum(out, 0.0)
            o_ref[...] = out.astype(o_ref.dtype)
    else:
        if has_residual:
            res_ref, o_ref = rest
        else:
            (o_ref,) = rest
        out = jnp.dot(x_ref[...], w_ref[...],
                      preferred_element_type=jnp.float32) + shift_ref[...]
        if has_residual:
            out = out + res_ref[...].astype(jnp.float32)
        if apply_relu:
            out = jnp.maximum(out, 0.0)
        o_ref[...] = out.astype(o_ref.dtype)


def _instance_stats_kernel(x_ref, mu_ref, sig_ref, *, eps):
    """Per-sample mean / std over the H*W axis (two-pass variance)."""
    x = x_ref[...].astype(jnp.float32)                    # (1, HW, C)
    mu = jnp.mean(x, axis=1, keepdims=True)               # (1, 1, C)
    var = jnp.mean(jnp.square(x - mu), axis=1, keepdims=True)
    mu_ref[...] = mu
    sig_ref[...] = jnp.sqrt(var + eps)


def _mix_apply_kernel(x_ref, scale_ref, bias_ref, o_ref):
    """out = x * scale + bias (per-sample, per-channel affine)."""
    x = x_ref[...].astype(jnp.float32)
    o_ref[...] = (x * scale_ref[...] + bias_ref[...]).astype(o_ref.dtype)


def _global_avgpool_kernel(x_ref, o_ref):
    o_ref[...] = jnp.mean(x_ref[...].astype(jnp.float32), axis=1).astype(o_ref.dtype)


# ---------------------------------------------------------------------------
# Pallas wrappers
# ---------------------------------------------------------------------------
def matmul_fused(a, w, shift, residual=None, relu=True, out_dtype=jnp.bfloat16):
    """out = act((a @ w) + shift [+ residual]); bf16 MXU path, f32 accumulate."""
    m, k = a.shape
    k2, n = w.shape
    assert k == k2
    tm = _pick_tile_sublane(m)
    tn = _pick_tile_lane(n)

    # Single full-depth K step whenever the bf16 operand tiles fit the budget,
    # otherwise fall back to 512-deep K steps with an f32 VMEM accumulator.
    k_pad = k if k % 128 == 0 else _round_up(k, 128)
    if k_pad * (tm + tn) * 2 <= _FULL_K_BYTES:
        tk = k_pad
    else:
        tk = 512
        k_pad = _round_up(k, tk)
    multi_k = (k_pad // tk) > 1

    a_op = a.astype(jnp.bfloat16)
    w_op = w.astype(jnp.bfloat16)
    if k_pad != k:
        a_op = jnp.pad(a_op, ((0, 0), (0, k_pad - k)))
        w_op = jnp.pad(w_op, ((0, k_pad - k), (0, 0)))
    shift_op = shift.reshape(1, n).astype(jnp.float32)

    operands = [a_op, w_op, shift_op]
    in_specs = [
        pl.BlockSpec((tm, tk), lambda i, j, kk: (i, kk)),
        pl.BlockSpec((tk, tn), lambda i, j, kk: (kk, j)),
        pl.BlockSpec((1, tn), lambda i, j, kk: (0, j)),
    ]
    has_residual = residual is not None
    if has_residual:
        operands.append(residual.astype(jnp.bfloat16))
        in_specs.append(pl.BlockSpec((tm, tn), lambda i, j, kk: (i, j)))

    scratch = [pltpu.VMEM((tm, tn), jnp.float32)] if multi_k else []
    kernel = functools.partial(_matmul_fused_kernel, apply_relu=relu,
                               has_residual=has_residual, multi_k=multi_k)
    return pl.pallas_call(
        kernel,
        out_shape=jax.ShapeDtypeStruct((m, n), out_dtype),
        grid_spec=pltpu.PrefetchScalarGridSpec(
            num_scalar_prefetch=0,
            grid=(m // tm, n // tn, k_pad // tk),
            in_specs=in_specs,
            out_specs=pl.BlockSpec((tm, tn), lambda i, j, kk: (i, j)),
            scratch_shapes=scratch,
        ),
        compiler_params=pltpu.CompilerParams(
            dimension_semantics=("parallel", "parallel", "arbitrary"),
            vmem_limit_bytes=_VMEM_LIMIT,
        ),
    )(*operands)


def _im2col_nhwc(x, kh, kw, stride, padding):
    """NHWC im2col (bf16): rows ordered (n, ho, wo), cols ordered (kh*kw, c)."""
    # TODO(synk): implicit-GEMM (tap-indexed manual DMA) to avoid materializing this.
    n, h, w, c = x.shape
    xp = jnp.pad(x, ((0, 0), (padding, padding), (padding, padding), (0, 0)))
    ho = (h + 2 * padding - kh) // stride + 1
    wo = (w + 2 * padding - kw) // stride + 1
    patches = []
    for i in range(kh):
        for j in range(kw):
            rs = i + stride * (ho - 1) + 1
            cs = j + stride * (wo - 1) + 1
            patches.append(xp[:, i:rs:stride, j:cs:stride, :])
    cols = jnp.stack(patches, axis=3)                 # (n, ho, wo, kh*kw, c)
    return cols.reshape(n * ho * wo, kh * kw * c), ho, wo


def _fold_conv_bn(w_oihw, bn):
    """Fold BN scale into a pre-transposed bf16 weight matrix; keep shift in f32."""
    cout, cin, kh, kw = w_oihw.shape
    scale = bn['gamma'] / jnp.sqrt(bn['var'] + _BN_EPS)
    shift = bn['beta'] - bn['mean'] * scale
    w_mat = jnp.transpose(w_oihw, (2, 3, 1, 0)).reshape(kh * kw * cin, cout)
    return {'w_mat': (w_mat * scale[None, :]).astype(jnp.bfloat16),
            'shift': shift.astype(jnp.float32),
            'kh': kh, 'kw': kw, 'cout': cout}


def conv2d_bn_act(x_nhwc, folded, *, stride, padding, relu=True, residual_nhwc=None):
    """Conv2d (no bias) + folded BatchNorm [+ residual] [+ ReLU], NHWC bf16."""
    n = x_nhwc.shape[0]
    kh, kw, cout = folded['kh'], folded['kw'], folded['cout']
    if kh == 1 and kw == 1 and padding == 0:
        xs = x_nhwc[:, ::stride, ::stride, :]
        _, ho, wo, cin = xs.shape
        cols = xs.reshape(n * ho * wo, cin)
    else:
        cols, ho, wo = _im2col_nhwc(x_nhwc, kh, kw, stride, padding)
    res2d = None
    if residual_nhwc is not None:
        res2d = residual_nhwc.reshape(n * ho * wo, cout)
    out2d = matmul_fused(cols, folded['w_mat'], folded['shift'],
                         residual=res2d, relu=relu, out_dtype=jnp.bfloat16)
    return out2d.reshape(n, ho, wo, cout)


def instance_stats(x3, eps=_MS_EPS):
    """Per-sample (mu, sigma) over axis 1 of a (N, HW, C) tensor."""
    n, hw, c = x3.shape
    return pl.pallas_call(
        functools.partial(_instance_stats_kernel, eps=eps),
        out_shape=(jax.ShapeDtypeStruct((n, 1, c), jnp.float32),
                   jax.ShapeDtypeStruct((n, 1, c), jnp.float32)),
        grid_spec=pltpu.PrefetchScalarGridSpec(
            num_scalar_prefetch=0,
            grid=(n,),
            in_specs=[pl.BlockSpec((1, hw, c), lambda i: (i, 0, 0))],
            out_specs=(pl.BlockSpec((1, 1, c), lambda i: (i, 0, 0)),
                       pl.BlockSpec((1, 1, c), lambda i: (i, 0, 0))),
        ),
        compiler_params=pltpu.CompilerParams(
            dimension_semantics=("parallel",),
            vmem_limit_bytes=_VMEM_LIMIT,
        ),
    )(x3)


def _mix_apply(x3, scale, bias):
    n, hw, c = x3.shape
    return pl.pallas_call(
        _mix_apply_kernel,
        out_shape=jax.ShapeDtypeStruct((n, hw, c), x3.dtype),
        grid_spec=pltpu.PrefetchScalarGridSpec(
            num_scalar_prefetch=0,
            grid=(n,),
            in_specs=[pl.BlockSpec((1, hw, c), lambda i: (i, 0, 0)),
                      pl.BlockSpec((1, 1, c), lambda i: (i, 0, 0)),
                      pl.BlockSpec((1, 1, c), lambda i: (i, 0, 0))],
            out_specs=pl.BlockSpec((1, hw, c), lambda i: (i, 0, 0)),
        ),
        compiler_params=pltpu.CompilerParams(
            dimension_semantics=("parallel",),
            vmem_limit_bytes=_VMEM_LIMIT,
        ),
    )(x3, scale, bias)


def mixstyle(x_nhwc, perm, lam, eps=_MS_EPS):
    """MixStyle: stats pass + tiny jnp mix of (N,1,C) stats + single-FMA apply pass."""
    n, h, w, c = x_nhwc.shape
    hw = h * w
    x3 = x_nhwc.reshape(n, hw, c)
    mu, sig = instance_stats(x3, eps)                  # (n, 1, c) f32
    perm = jnp.asarray(perm, dtype=jnp.int32)
    lam = lam.astype(jnp.float32)                      # (n, 1, 1)
    mu_mix = lam * mu + (1.0 - lam) * mu[perm]
    sig_mix = lam * sig + (1.0 - lam) * sig[perm]
    scale = sig_mix / sig
    bias = mu_mix - mu * scale
    out = _mix_apply(x3, scale, bias)
    return out.reshape(n, h, w, c)


def global_avgpool(x_nhwc):
    n, h, w, c = x_nhwc.shape
    hw = h * w
    x3 = x_nhwc.reshape(n, hw, c)
    return pl.pallas_call(
        _global_avgpool_kernel,
        out_shape=jax.ShapeDtypeStruct((n, c), jnp.float32),
        grid_spec=pltpu.PrefetchScalarGridSpec(
            num_scalar_prefetch=0,
            grid=(n,),
            in_specs=[pl.BlockSpec((1, hw, c), lambda i: (i, 0, 0))],
            out_specs=pl.BlockSpec((1, c), lambda i: (i, 0)),
        ),
        compiler_params=pltpu.CompilerParams(
            dimension_semantics=("parallel",),
            vmem_limit_bytes=_VMEM_LIMIT,
        ),
    )(x3)


def maxpool_3x3_s2(x_nhwc):
    # TODO(synk): 3x3/stride-2 max-pool window reduction kept in XLA (tiny, not the hot path).
    n, h, w, c = x_nhwc.shape
    xp = jnp.pad(x_nhwc, ((0, 0), (1, 1), (1, 1), (0, 0)),
                 constant_values=-jnp.inf)
    ho = (h + 2 - 3) // 2 + 1
    wo = (w + 2 - 3) // 2 + 1
    out = jnp.full((n, ho, wo, c), -jnp.inf, dtype=x_nhwc.dtype)
    for i in range(3):
        for j in range(3):
            rs = i + 2 * (ho - 1) + 1
            cs = j + 2 * (wo - 1) + 1
            out = jnp.maximum(out, xp[:, i:rs:2, j:cs:2, :])
    return out


# ---------------------------------------------------------------------------
# Parameters / model
# ---------------------------------------------------------------------------
def _kaiming_conv(key, shape):
    cout, _, kh, kw = shape
    std = float(np.sqrt(2.0 / (cout * kh * kw)))   # kaiming_normal_, fan_out, relu
    return jax.random.normal(key, shape, dtype=jnp.float32) * std


def _bn_params(c):
    # _init_params: weight=1, bias=0; fresh running stats mean=0, var=1.
    return {'gamma': jnp.ones((c,), jnp.float32),
            'beta': jnp.zeros((c,), jnp.float32),
            'mean': jnp.zeros((c,), jnp.float32),
            'var': jnp.ones((c,), jnp.float32)}


def _basic_block_params(key, inplanes, planes, stride):
    k1, k2, k3 = jax.random.split(key, 3)
    blk = {
        'conv1': _fold_conv_bn(_kaiming_conv(k1, (planes, inplanes, 3, 3)),
                               _bn_params(planes)),
        'conv2': _fold_conv_bn(_kaiming_conv(k2, (planes, planes, 3, 3)),
                               _bn_params(planes)),
        'stride': stride,
        'downsample': None,
    }
    if stride != 1 or inplanes != planes:
        blk['downsample'] = _fold_conv_bn(_kaiming_conv(k3, (planes, inplanes, 1, 1)),
                                          _bn_params(planes))
    return blk


def _basic_block_forward(x, blk):
    # out = relu(bn1(conv1(x))); out = bn2(conv2(out)) + residual; out = relu(out)
    out = conv2d_bn_act(x, blk['conv1'], stride=blk['stride'], padding=1, relu=True)
    if blk['downsample'] is not None:
        residual = conv2d_bn_act(x, blk['downsample'], stride=blk['stride'],
                                 padding=0, relu=False)
    else:
        residual = x
    return conv2d_bn_act(out, blk['conv2'], stride=1, padding=1, relu=True,
                         residual_nhwc=residual)


def _crossdomain_perm(rng, b):
    """MixStyle 'crossdomain' permutation (host-side numpy, deterministic)."""
    perm = np.arange(b - 1, -1, -1)
    half = b // 2
    perm_b = perm[:half][rng.permutation(half)] if half > 0 else perm[:0]
    perm_a = perm[half:][rng.permutation(b - half)]
    return np.concatenate([perm_b, perm_a]).astype(np.int32)


class ResNetMixStyle:
    """JAX/Pallas port of ResNet_mixstyle (BasicBlock configuration)."""
    # TODO(synk): Bottleneck blocks would reuse the same fused conv kernel; only
    # the BasicBlock configuration is instantiated here to keep the demo small.

    def __init__(self, key, layers=(1, 1, 1, 1), num_classes=10, loss='softmax',
                 last_stride=2, mixstyle_layers=('layer1', 'layer2'),
                 mixstyle_p=1.0, mixstyle_alpha=0.3):
        self.loss = loss
        self.num_classes = num_classes
        self.mixstyle_layers = tuple(mixstyle_layers)
        self.mixstyle_p = float(mixstyle_p)
        self.mixstyle_alpha = float(mixstyle_alpha)
        expansion = 1                      # BasicBlock.expansion
        self.feature_dim = 512 * expansion
        self._out_features = 512 * expansion

        keys = jax.random.split(key, 7)
        self.inplanes = 64
        stem_w = _kaiming_conv(keys[0], (64, 3, 7, 7))
        stem_bn = _bn_params(64)
        params = {'stem': _fold_conv_bn(stem_w, stem_bn),
                  'stem_raw': {'w': stem_w, 'bn': stem_bn}}
        params['layer1'] = self._make_layer(keys[1], 64, layers[0], stride=1)
        params['layer2'] = self._make_layer(keys[2], 128, layers[1], stride=2)
        params['layer3'] = self._make_layer(keys[3], 256, layers[2], stride=2)
        params['layer4'] = self._make_layer(keys[4], 512, layers[3], stride=last_stride)
        # classifier: Linear(feature_dim, num_classes), N(0, 0.01) weights, zero bias.
        fc_w = 0.01 * jax.random.normal(keys[5], (num_classes, self.feature_dim),
                                        dtype=jnp.float32)
        params['fc_w_t'] = jnp.transpose(fc_w)                 # pre-transposed once
        params['fc_b'] = jnp.zeros((num_classes,), jnp.float32)
        self.params = params
        # TODO(synk): fc_dims / dropout stack of _construct_fc_layer omitted (fc_dims=None default).

    def _make_layer(self, key, planes, blocks, stride):
        keys = jax.random.split(key, blocks)
        layer = []
        for b in range(blocks):
            s = stride if b == 0 else 1
            layer.append(_basic_block_params(keys[b], self.inplanes, planes, s))
            self.inplanes = planes
        return layer

    def out_features(self):
        return self._out_features

    @staticmethod
    def _run_layer(x, layer_params):
        for blk in layer_params:
            x = _basic_block_forward(x, blk)
        return x

    def _maybe_mixstyle(self, x, name, rng, training):
        if (not training) or (name not in self.mixstyle_layers):
            return x
        # TODO(synk): apply-probability / Beta / permutation sampling is host-side
        # (numpy, deterministic); PyTorch's MixStyle samples inside forward().
        if rng.rand() > self.mixstyle_p:
            return x
        n = x.shape[0]
        lam = jnp.asarray(rng.beta(self.mixstyle_alpha, self.mixstyle_alpha,
                                   size=(n, 1, 1)).astype(np.float32))
        perm = _crossdomain_perm(rng, n)
        return mixstyle(x, perm, lam)

    def featuremaps(self, x_nhwc, seed, training):
        p = self.params
        rng = np.random.RandomState(seed)
        x = conv2d_bn_act(x_nhwc, p['stem'], stride=2, padding=3, relu=True)
        x = maxpool_3x3_s2(x)
        x = self._run_layer(x, p['layer1'])
        x = self._maybe_mixstyle(x, 'layer1', rng, training)
        x = self._run_layer(x, p['layer2'])
        x = self._maybe_mixstyle(x, 'layer2', rng, training)
        x = self._run_layer(x, p['layer3'])
        x = self._maybe_mixstyle(x, 'layer3', rng, training)
        x = self._run_layer(x, p['layer4'])
        return x

    def forward(self, x_nchw, seed=0, training=True):
        # NCHW (PyTorch convention) -> NHWC bf16 internally (lane-dense channels).
        x = jnp.transpose(x_nchw, (0, 2, 3, 1)).astype(jnp.bfloat16)
        f = self.featuremaps(x, seed, training)
        v = global_avgpool(f)                       # (N, feature_dim) f32
        if not training:                            # eval: return features
            return v
        y = matmul_fused(v, self.params['fc_w_t'], self.params['fc_b'],
                         residual=None, relu=False, out_dtype=jnp.float32)
        if self.loss == 'softmax':
            return y
        if self.loss == 'triplet':
            return y, v
        raise KeyError('Unsupported loss: {}'.format(self.loss))


# ---------------------------------------------------------------------------
# Pure-JAX references for unit checks
# ---------------------------------------------------------------------------
def _conv_bn_relu_ref(x_nchw, w_oihw, bn, stride, padding, relu):
    y = jax.lax.conv_general_dilated(
        x_nchw.astype(jnp.float32), w_oihw.astype(jnp.float32),
        window_strides=(stride, stride),
        padding=[(padding, padding), (padding, padding)],
        dimension_numbers=('NCHW', 'OIHW', 'NCHW'))
    scale = (bn['gamma'] / jnp.sqrt(bn['var'] + _BN_EPS)).reshape(1, -1, 1, 1)
    shift = (bn['beta'] - bn['mean'] * bn['gamma'] /
             jnp.sqrt(bn['var'] + _BN_EPS)).reshape(1, -1, 1, 1)
    y = y * scale + shift
    return jnp.maximum(y, 0.0) if relu else y


def _mixstyle_ref(x_nhwc, perm, lam, eps=_MS_EPS):
    x = x_nhwc.astype(jnp.float32)
    mu = jnp.mean(x, axis=(1, 2), keepdims=True)
    var = jnp.mean(jnp.square(x - mu), axis=(1, 2), keepdims=True)
    sig = jnp.sqrt(var + eps)
    x_norm = (x - mu) / sig
    lam4 = lam.reshape(-1, 1, 1, 1)
    mu_mix = lam4 * mu + (1.0 - lam4) * mu[np.asarray(perm)]
    sig_mix = lam4 * sig + (1.0 - lam4) * sig[np.asarray(perm)]
    return x_norm * sig_mix + mu_mix


# ---------------------------------------------------------------------------
# Demo / checks
# ---------------------------------------------------------------------------
if __name__ == "__main__":
    root = jax.random.PRNGKey(0)
    k_param, k_data, k_check = jax.random.split(root, 3)

    # Small NCHW input (ImageNet-style 3-channel image, small spatial size).
    x = jax.random.normal(k_data, (2, 3, 64, 64), dtype=jnp.float32)

    model = ResNetMixStyle(k_param, layers=(1, 1, 1, 1), num_classes=10,
                           loss='softmax', mixstyle_layers=('layer1', 'layer2'),
                           mixstyle_p=1.0, mixstyle_alpha=0.3)
    assert model.out_features() == 512

    # --- check 1: fused bf16 conv+BN+ReLU Pallas kernel vs XLA conv reference ---
    x_bf = x.astype(jnp.bfloat16)
    x_nhwc = jnp.transpose(x_bf, (0, 2, 3, 1))
    y_kernel = conv2d_bn_act(x_nhwc, model.params['stem'],
                             stride=2, padding=3, relu=True)
    y_ref = _conv_bn_relu_ref(x_bf, model.params['stem_raw']['w'].astype(jnp.bfloat16),
                              model.params['stem_raw']['bn'], 2, 3, True)
    np.testing.assert_allclose(
        np.asarray(jnp.transpose(y_kernel, (0, 3, 1, 2)).astype(jnp.float32)),
        np.asarray(y_ref), rtol=3e-2, atol=3e-2)

    # --- check 2: MixStyle (stats kernel + mix-apply kernel) vs pure-JAX reference ---
    xm = jax.random.normal(k_check, (2, 8, 8, 16), dtype=jnp.float32)
    perm = np.array([1, 0], dtype=np.int32)
    lam = jnp.asarray(np.random.RandomState(1).beta(0.3, 0.3, (2, 1, 1)).astype(np.float32))
    np.testing.assert_allclose(np.asarray(mixstyle(xm, perm, lam)),
                               np.asarray(_mixstyle_ref(xm, perm, lam)),
                               rtol=1e-3, atol=1e-3)

    # --- full forward pass (training mode: MixStyle active, returns logits) ---
    logits = model.forward(x, seed=0, training=True)
    logits = jax.block_until_ready(logits)
    assert logits.shape == (2, 10)
    assert bool(jnp.all(jnp.isfinite(logits)))

    # --- eval mode returns the pooled feature vector ---
    feats = jax.block_until_ready(model.forward(x, seed=0, training=False))
    assert feats.shape == (2, 512)

    print("KERNEL_OK")
</pallas_src>

<mosaic_0001>
module attributes {stable_mosaic.version = 11 : i64} {
  func.func @_matmul_fused_kernel(%arg0: i32, %arg1: i32, %arg2: i32, %arg3: memref<256x256xbf16, #tpu.memory_space<vmem>>, %arg4: memref<256x64xbf16, #tpu.memory_space<vmem>>, %arg5: memref<1x64xf32, #tpu.memory_space<vmem>>, %arg6: memref<256x64xbf16, #tpu.memory_space<vmem>>) attributes {dimension_semantics = [#tpu.dimension_semantics<parallel>, #tpu.dimension_semantics<parallel>, #tpu.dimension_semantics<arbitrary>], iteration_bounds = array<i64: 8, 1, 1>, scalar_prefetch = 0 : i64, scratch_operands = 0 : i64, tpu.core_type = #tpu.core_type<tc>, window_params = [{transform_indices = @transform_0, window_bounds = array<i64: 256, 256>}, {transform_indices = @transform_1, window_bounds = array<i64: 256, 64>}, {transform_indices = @transform_2, window_bounds = array<i64: 1, 64>}, {transform_indices = @transform_3, window_bounds = array<i64: 256, 64>}]} {
    %c0 = arith.constant 0 : index
    %c0_0 = arith.constant 0 : index
    %0 = vector.load %arg3[%c0, %c0_0] : memref<256x256xbf16, #tpu.memory_space<vmem>>, vector<256x256xbf16>
    %c0_1 = arith.constant 0 : index
    %c0_2 = arith.constant 0 : index
    %1 = vector.load %arg4[%c0_1, %c0_2] : memref<256x64xbf16, #tpu.memory_space<vmem>>, vector<256x64xbf16>
    %cst = arith.constant dense<0.000000e+00> : vector<256x64xf32>
    %2 = tpu.matmul %0, %1, %cst {dimension_numbers = #tpu.dot_dimension_numbers<[1], [0], [0], [1], [0, 0, 1, 1], [], []>} : vector<256x256xbf16>, vector<256x64xbf16>, vector<256x64xf32> -> vector<256x64xf32>
    %c0_3 = arith.constant 0 : index
    %c0_4 = arith.constant 0 : index
    %3 = vector.load %arg5[%c0_3, %c0_4] : memref<1x64xf32, #tpu.memory_space<vmem>>, vector<1x64xf32>
    %4 = vector.broadcast %3 : vector<1x64xf32> to vector<256x64xf32>
    %5 = arith.addf %2, %4 : vector<256x64xf32>
    %cst_5 = arith.constant 0.000000e+00 : f32
    %6 = vector.broadcast %cst_5 : f32 to vector<256x64xf32>
    %7 = arith.maximumf %5, %6 : vector<256x64xf32>
    %8 = arith.truncf %7 : vector<256x64xf32> to vector<256x64xbf16>
    %c0_6 = arith.constant 0 : index
    %c0_7 = arith.constant 0 : index
    %9 = vector.load %arg6[%c0_6, %c0_7] : memref<256x64xbf16, #tpu.memory_space<vmem>>, vector<256x64xbf16>
    tpu.vector_store %arg6[%c0_6, %c0_7], %8 {strides = array<i32>} : memref<256x64xbf16, #tpu.memory_space<vmem>>, vector<256x64xbf16>,
    return
  }
  func.func @transform_0(%arg0: i32, %arg1: i32, %arg2: i32) -> (i32, i32) {
    %c0_i32 = arith.constant 0 : i32
    return %arg0, %arg2 : i32, i32
  }
  func.func @transform_1(%arg0: i32, %arg1: i32, %arg2: i32) -> (i32, i32) {
    %c0_i32 = arith.constant 0 : i32
    return %arg2, %arg1 : i32, i32
  }
  func.func @transform_2(%arg0: i32, %arg1: i32, %arg2: i32) -> (i32, i32) {
    %c0_i32 = arith.constant 0 : i32
    %c0_i32_0 = arith.constant 0 : i32
    return %c0_i32, %arg1 : i32, i32
  }
  func.func @transform_3(%arg0: i32, %arg1: i32, %arg2: i32) -> (i32, i32) {
    %c0_i32 = arith.constant 0 : i32
    return %arg0, %arg1 : i32, i32
  }
}

</mosaic_0001>

<bundles_post_ra>
// kernel: tpu_custom_call.1
= control target key start
LH: loop header
LB: loop body
LE: loop exit
PB: predicated region body
PF: predicated region fallthrough
CT: control target
= control target key end

     0   :  { %8 = vsyncpa [#allocation3], 0  ;;  %s1870_s0 = inlined_call_operand.hbm [shape: bf16[2048,256], index: 0, kind: input, shape index: {}]   ;;  %s1871_s1 = inlined_call_operand.vmem [shape: bf16[256,64], index: 1, kind: input, shape index: {}]   ;;  %s1872_s2 = inlined_call_operand.vmem [shape: f32[1,64], index: 2, kind: input, shape index: {}]   ;;  %s1873_s3 = inlined_call_operand.vmem [shape: bf16[2048,64], index: 3, kind: output, shape index: {}]  }
   0x1   :  { %10 = vsyncpa [#allocation3 + $0x1], 0  ;;  %s1562_s12 = smov 0   ;;  %s1564_s13 = smov 0  }
   0x2   :  { %s1566_s14 = smov 0   ;;  %s1568_s15 = smov 0  }
   0x3   :  { %s1570_s16 = smov 0   ;;  %s1572_s17 = smov 0  }
   0x4 LB: > { %s1077_s18 = sadd.s32 4294967295, %s1537_s17   ;;  %s35_s19 = sadd.s32 1, %s1533_s16  ;;  %s1537_s17 = sphi %s1572_s17, %s16_s17   ;;  %s1533_s16 = sphi %s1570_s16, %s1881_s16   ;;  %s1529_s15 = sphi %s1568_s15, %s1880_s15   ;;  %s1525_s14 = sphi %s1566_s14, %s1879_s14   ;;  %s1521_s13 = sphi %s1564_s13, %s1878_s13   ;;  %s1517_s12 = sphi %s1562_s12, %s1877_s12  }
   0x5   : > { %p37_p0 = scmp.ge.s32.totalorder %s35_s19, 8  ;;  %s44_s20 = sadd.s32 1, %s1525_s14 }
   0x6   : > { %p51_p1 = scmp.ne.s32.totalorder %s1525_s14, %s1521_s13  ;;  %p52_p2 = scmp.eq.s32.totalorder %s1537_s17, 0 }
   0x7   : > { %s1883_s19 = smov (%p37_p0, %s35_s19), 0  ;;  %p57_p4 = scmp.ne.s32.totalorder %s1521_s13, %s1517_s12 }
   0x8   : > { %p1598_p3 = por %p52_p2, %p51_p1  ;;  %s39_s22 = ssub.s32 %s1533_s16, %s1883_s19 }
   0x9   : > { %p58_p5 = scmp.eq.s32.totalorder %s1077_s18, 0  ;;  %p42_p6 = scmp.eq.s32.totalorder %s39_s22, 0 }
   0xa   : > { %p1342_p8 = scmp.lt.s32.totalorder %s1537_s17, 8  ;;  %s181_s25 = sand.u32 1, %s1525_s14  }
   0xb   : > { %p1605_p7 = por %p58_p5, %p57_p4  ;;  %s1175_s26 = sshll.u32 %s1533_s16, 12 }
   0xc   : > { %s1611_s24 = scalar_select %p42_p6, %s1525_s14, %s44_s20  }
   0xd   : > { %s1083_s27 = sshll.u32 %s181_s25, 8  ;;  %s1618_s30 = scalar_lea.hbm %s1870_s0, %s1175_s26 }
   0xe   : > { %s185_s4 = scalar_lea.vmem [#allocation2], %s1083_s27  ;;  %p1622_p9 = pnand %p1342_p8, %p1598_p3 }
   0xf   : > { %s195_s5 = sshll.u32 %s185_s4, 4  ;;  %s1628_s7 = scalar_lea.sflag [#allocation3], %s181_s25  ;;  %s1626_s5 = int_to_ptr.vmem [resolvable:$true] %s195_s5 }
  0x10   : > { %s1457_s8 = scalar_lea.hbm %s1618_s30, 4096  ;;  %p1459_p11 = pneg %p1622_p9 }
  0x11   : > { %p1458_p10 = scmp.ne.s32.totalorder %s1618_s30, %s1457_s8  ;;  %s1462_s11 = scalar_lea.hbm %s1870_s0, 32768 }
  0x12   : > { %p1463_p0 = scmp.lt.u32.totalorder %s1618_s30, %s1870_s0  ;;  %p1464_p1 = scmp.lt.u32.totalorder %s1462_s11, %s1457_s8 }
  0x13   : > { %p1460_p12 = pnand %p1459_p11, %p1458_p10  ;;  %p1466_p3 = scmp.lt.u32.totalorder %s1457_s8, %s1618_s30 }
  0x14   : > { %p1465_p2 = por %p1464_p1, %p1463_p0 }
  0x15   : > { %p1461_p13 = pneg %p1460_p12 }
  0x16   : > { %p1467_p4 = por %p1466_p3, %p1465_p2 }
  0x18   : > { %p1468_p5 = pnand %p1467_p4, %p1461_p13 }
  0x1a   : > { %1471 = shalt.err (!%p1468_p5)
}
  0x1b   : > { %s1472_s20 = scalar_lea.vmem %s1626_s5, 4096  ;;  %s1539_s21 = smov [#allocation2]  }
  0x1c   : > { %p1473_p6 = scmp.ne.s32.totalorder %s1626_s5, %s1472_s20  ;;  %s1477_s22 = sshll.u32 %s1539_s21, 4  ;;  %s1478_s22 = int_to_ptr.vmem [resolvable:$false] %s1477_s22 }
  0x1d   : > { %s1479_s25 = scalar_lea.vmem %s1478_s22, 8192  ;;  %p1480_p12 = scmp.lt.s32.totalorder %s1626_s5, %s1478_s22 }
  0x1e   : > { %p1475_p8 = pnand %p1473_p6, %p1459_p11  ;;  %p1481_p0 = scmp.lt.s32.totalorder %s1479_s25, %s1472_s20 }
  0x20   : > { %p1476_p10 = pneg %p1475_p8  ;;  %p1482_p1 = por %p1481_p0, %p1480_p12 }
  0x22   : > { %p1483_p2 = pnand %p1482_p1, %p1476_p10 }
  0x24   : > { %1486 = shalt.err (!%p1483_p2)
}
  0x25   : > { %s1540_s26 = smov 128   ;;  %s1541_s27 = smov 8  }
  0x26   : > { %1341 = dma.hbm_to_vmem [thread:$0]  (!%p1622_p9), %s1618_s30, 4096, %s1626_s5, %s1628_s7, %s1540_s26, %s1540_s26, %s1541_s27  }
  0x27   : > { %p1087_p11 = scmp.ge.s32.totalorder %s1537_s17, 1  ;;  %p203_p13 = scmp.lt.s32.totalorder %s1537_s17, 9 }
  0x29   : > { %p204_p3 = pnand %p1087_p11, %p203_p13 }
  0x2a   : > { %s209_s28 = sand.u32 (!%p204_p3), 1, %s1521_s13  }
  0x2b   : > { %207 = sbr.rel (%p204_p3) target bundleno = 364 (0x16c), region = 32  ;;  %s1088_s29 = sshll.u32 (!%p204_p3), %s209_s28, 8 }
  0x2c   : > { %s210_s4 = scalar_lea.sflag (!%p204_p3), [#allocation3], %s209_s28  ;;  %s1659_s8 = scalar_lea.vmem (!%p204_p3), [#allocation2], %s1088_s29 }
  0x32   : > { %1512 = dma.done.wait (%p1605_p7), %s210_s4, 4096  }
  0x33   : > { %1514 = vsyncadd (%p1605_p7), %s210_s4, 4294963200  ;;  %v1393_v0 = vld [vmem:[%s1871_s1 + $0x40] sm:$0xff]   ;;  %v1395_v2 = vld [vmem:[%s1871_s1 + $0x48] sm:$0xff]   ;;  %s1089_s25 = sshll.u32 %s1529_s15, 5  ;;  %vm922_vm0 = vcmask 519168  }
  0x34   : > { %v1394_v1 = vld [vmem:[%s1871_s1] sm:$0xff]   ;;  %1208 = vmatprep.subr.bf16.mxu0 %v1393_v0  ;;  %1320 = vmatprep.subr.bf16.mxu1 %v1393_v0  ;;  %v1396_v3 = vld [vmem:[%s1871_s1 + $0x8] sm:$0xff]   ;;  %v1397_v4 = vld [vmem:[%s1871_s1 + $0x50] sm:$0xff]   ;;  %p265_p7 = scmp.lt.s32.totalorder %s1089_s25, 255 }
  0x35   : > { %1209 = vmatpush3.bf16.msra.mxu0 %v1394_v1  ;;  %1328 = vmatpush3.bf16.msra.mxu1 %v1394_v1  ;;  %v1398_v5 = vld [vmem:[%s1871_s1 + $0x10] sm:$0xff]   ;;  %v1399_v6 = vld [vmem:[%s1871_s1 + $0x58] sm:$0xff]   ;;  %v1401_v8 = vld [vmem:[%s1871_s1 + $0x60] sm:$0xff]  }
  0x36   : > { %1210 = vmatprep.subr.bf16.mxu0 %v1395_v2  ;;  %1321 = vmatprep.subr.bf16.mxu1 %v1395_v2  ;;  %v1400_v7 = vld [vmem:[%s1871_s1 + $0x18] sm:$0xff]   ;;  %v1402_v9 = vld [vmem:[%s1871_s1 + $0x20] sm:$0xff]   ;;  %v1403_v10 = vld [vmem:[%s1871_s1 + $0x68] sm:$0xff]   ;;  %s1885_s25 = smov (!%p265_p7, %s1089_s25), 255 }
  0x37   : > { %v1411_v11 = vld [vmem:[%s1659_s8 + $0x4] ss:$8 sps:$4 sm:$0xff]   ;;  %v1405_v14 = vld [vmem:[%s1871_s1 + $0x70] sm:$0xff]   ;;  %v1407_v16 = vld [vmem:[%s1871_s1 + $0x78] sm:$0xff]  }
  0x38   : > { %v1414_v12 = vld [vmem:[%s1659_s8 + $0x84] ss:$8 sps:$4 sm:$0xff]   ;;  %633 = vmatprep.mubr.bf16.mxu0 %v1411_v11  ;;  %v1406_v15 = vld [vmem:[%s1871_s1 + $0x30] sm:$0xff]   ;;  %v1408_v17 = vld [vmem:[%s1871_s1 + $0x38] sm:$0xff]  }
  0x39   : > { %1211 = vmatpush3.bf16.msra.mxu0 %v1396_v3  ;;  %1329 = vmatpush3.bf16.msra.mxu1 %v1396_v3  ;;  %v1404_v13 = vld [vmem:[%s1871_s1 + $0x28] sm:$0xff]   ;;  %v1415_v20 = vld [vmem:[%s1659_s8 + $0x14] ss:$8 sps:$4 sm:$0xff]   ;;  %v1419_v22 = vld [vmem:[%s1659_s8 + $0x10] ss:$8 sps:$4 sm:$0xff]  }
  0x3a   : > { %1212 = vmatprep.subr.bf16.mxu0 %v1397_v4  ;;  %1322 = vmatprep.subr.bf16.mxu1 %v1397_v4  ;;  %v1409_v18 = vld [vmem:[%s1659_s8] ss:$8 sps:$4 sm:$0xff]   ;;  %v1417_v21 = vld [vmem:[%s1659_s8 + $0x94] ss:$8 sps:$4 sm:$0xff]   ;;  %v1420_v23 = vld [vmem:[%s1659_s8 + $0x90] ss:$8 sps:$4 sm:$0xff]  }
  0x3b   : > { %697 = vmatprep.mubr.bf16.mxu1 %v1414_v12  ;;  %v1412_v19 = vld [vmem:[%s1659_s8 + $0x80] ss:$8 sps:$4 sm:$0xff]   ;;  %v1421_v24 = vld [vmem:[%s1659_s8 + $0x24] ss:$8 sps:$4 sm:$0xff]   ;;  %v1427_v28 = vld [vmem:[%s1659_s8 + $0x34] ss:$8 sps:$4 sm:$0xff]  }
  0x3c   : > { %v1423_v25 = vld [vmem:[%s1659_s8 + $0xa4] ss:$8 sps:$4 sm:$0xff]   ;;  %v1425_v26 = vld [vmem:[%s1659_s8 + $0x20] ss:$8 sps:$4 sm:$0xff]   ;;  %v1429_v29 = vld [vmem:[%s1659_s8 + $0xb4] ss:$8 sps:$4 sm:$0xff]  }
  0x3d   : > { %1213 = vmatpush3.bf16.msra.mxu0 %v1398_v5  ;;  %1330 = vmatpush3.bf16.msra.mxu1 %v1398_v5  ;;  %v1426_v27 = vld [vmem:[%s1659_s8 + $0xa0] ss:$8 sps:$4 sm:$0xff]   ;;  %v1431_v30 = vld [vmem:[%s1659_s8 + $0x30] ss:$8 sps:$4 sm:$0xff]   ;;  %v1433_v32 = vld [vmem:[%s1659_s8 + $0x44] ss:$8 sps:$4 sm:$0xff]  }
  0x3e   : > { %1214 = vmatprep.subr.bf16.mxu0 %v1399_v6  ;;  %1323 = vmatprep.subr.bf16.mxu1 %v1399_v6  ;;  %v1432_v31 = vld [vmem:[%s1659_s8 + $0xb0] ss:$8 sps:$4 sm:$0xff]   ;;  %v1435_v33 = vld [vmem:[%s1659_s8 + $0xc4] ss:$8 sps:$4 sm:$0xff]   ;;  %v1437_v34 = vld [vmem:[%s1659_s8 + $0x40] ss:$8 sps:$4 sm:$0xff]  }
  0x3f   : > { %v1438_v35 = vld [vmem:[%s1659_s8 + $0xc0] ss:$8 sps:$4 sm:$0xff]   ;;  %v1439_v36 = vld [vmem:[%s1659_s8 + $0x54] ss:$8 sps:$4 sm:$0xff]   ;;  %v1443_v38 = vld [vmem:[%s1659_s8 + $0x50] ss:$8 sps:$4 sm:$0xff]  }
  0x40   : > { %v1441_v37 = vld [vmem:[%s1659_s8 + $0xd4] ss:$8 sps:$4 sm:$0xff]   ;;  %v1444_v39 = vld [vmem:[%s1659_s8 + $0xd0] ss:$8 sps:$4 sm:$0xff]   ;;  %v1445_v40 = vld [vmem:[%s1659_s8 + $0x64] ss:$8 sps:$4 sm:$0xff]  }
  0x41   : > { %1215 = vmatpush3.bf16.msra.mxu0 %v1400_v7  ;;  %1331 = vmatpush3.bf16.msra.mxu1 %v1400_v7  ;;  %v1447_v41 = vld [vmem:[%s1659_s8 + $0xe4] ss:$8 sps:$4 sm:$0xff]   ;;  %v1449_v42 = vld [vmem:[%s1659_s8 + $0x60] ss:$8 sps:$4 sm:$0xff]   ;;  %v1451_v44 = vld [vmem:[%s1659_s8 + $0x74] ss:$8 sps:$4 sm:$0xff]  }
  0x42   : > { %1216 = vmatprep.subr.bf16.mxu0 %v1401_v8  ;;  %1324 = vmatprep.subr.bf16.mxu1 %v1401_v8  ;;  %v1450_v43 = vld [vmem:[%s1659_s8 + $0xe0] ss:$8 sps:$4 sm:$0xff]   ;;  %v1453_v45 = vld [vmem:[%s1659_s8 + $0xf4] ss:$8 sps:$4 sm:$0xff]   ;;  %v1455_v46 = vld [vmem:[%s1659_s8 + $0x70] ss:$8 sps:$4 sm:$0xff]  }
  0x43   : > { %v1456_v47 = vld [vmem:[%s1659_s8 + $0xf0] ss:$8 sps:$4 sm:$0xff]   ;;  %v1749_v50 = vld [vmem:[%s1872_s2] ss:$0 sm:$0xff]  ;;  %s1090_s8 = sshll.u32 %s1885_s25, 2 }
  0x44   : > { %s1758_s29 = scalar_lea.vmem %s1873_s3, %s1090_s8 }
  0x45   : > { %1217 = vmatpush3.bf16.msra.mxu0 %v1402_v9  ;;  %1332 = vmatpush3.bf16.msra.mxu1 %v1402_v9 }
  0x46   : > { %1218 = vmatprep.subr.bf16.mxu0 %v1403_v10  ;;  %1325 = vmatprep.subr.bf16.mxu1 %v1403_v10 }
  0x49   : > { %1219 = vmatpush3.bf16.msra.mxu0 %v1404_v13  ;;  %1333 = vmatpush3.bf16.msra.mxu1 %v1404_v13 }
  0x4a   : > { %1220 = vmatprep.subr.bf16.mxu0 %v1405_v14  ;;  %1326 = vmatprep.subr.bf16.mxu1 %v1405_v14 }
  0x4d   : > { %1221 = vmatpush3.bf16.msra.mxu0 %v1406_v15  ;;  %1334 = vmatpush3.bf16.msra.mxu1 %v1406_v15 }
  0x4e   : > { %1222 = vmatprep.subr.bf16.mxu0 %v1407_v16  ;;  %1327 = vmatprep.subr.bf16.mxu1 %v1407_v16 }
  0x51   : > { %1223 = vmatpush3.bf16.msra.mxu0 %v1408_v17  ;;  %1335 = vmatpush3.bf16.msra.mxu1 %v1408_v17 }
  0x54   : > { %634 = vmatmul.mubr.bf16.vlgmr.msra.gmra.mrb[0].mxu0 %v1409_v18  ;;  %698 = vmatmul.mubr.bf16.vlgmr.msra.gmra.mrb[0].mxu1 %v1412_v19 }
  0x55   : > { %641 = vmatprep.mubr.bf16.mxu0 %v1415_v20  ;;  %705 = vmatprep.mubr.bf16.mxu1 %v1417_v21 }
  0x5c   : > { %642 = vmatmul.mubr.bf16.gmra.mrb[4].mxu0 %v1419_v22  ;;  %706 = vmatmul.mubr.bf16.gmra.mrb[4].mxu1 %v1420_v23 }
  0x5d   : > { %649 = vmatprep.mubr.bf16.mxu0 %v1421_v24  ;;  %713 = vmatprep.mubr.bf16.mxu1 %v1423_v25 }
  0x64   : > { %650 = vmatmul.mubr.bf16.gmra.mrb[8].mxu0 %v1425_v26  ;;  %714 = vmatmul.mubr.bf16.gmra.mrb[8].mxu1 %v1426_v27 }
  0x65   : > { %657 = vmatprep.mubr.bf16.mxu0 %v1427_v28  ;;  %721 = vmatprep.mubr.bf16.mxu1 %v1429_v29 }
  0x6c   : > { %658 = vmatmul.mubr.bf16.gmra.mrb[12].mxu0 %v1431_v30  ;;  %722 = vmatmul.mubr.bf16.gmra.mrb[12].mxu1 %v1432_v31 }
  0x6d   : > { %665 = vmatprep.mubr.bf16.mxu0 %v1433_v32  ;;  %729 = vmatprep.mubr.bf16.mxu1 %v1435_v33 }
  0x74   : > { %666 = vmatmul.mubr.bf16.gmra.mrb[16].mxu0 %v1437_v34  ;;  %730 = vmatmul.mubr.bf16.gmra.mrb[16].mxu1 %v1438_v35 }
  0x75   : > { %673 = vmatprep.mubr.bf16.mxu0 %v1439_v36  ;;  %737 = vmatprep.mubr.bf16.mxu1 %v1441_v37 }
  0x7c   : > { %674 = vmatmul.mubr.bf16.gmra.mrb[20].mxu0 %v1443_v38  ;;  %738 = vmatmul.mubr.bf16.gmra.mrb[20].mxu1 %v1444_v39 }
  0x7d   : > { %681 = vmatprep.mubr.bf16.mxu0 %v1445_v40  ;;  %745 = vmatprep.mubr.bf16.mxu1 %v1447_v41 }
  0x84   : > { %682 = vmatmul.mubr.bf16.gmra.mrb[24].mxu0 %v1449_v42  ;;  %746 = vmatmul.mubr.bf16.gmra.mrb[24].mxu1 %v1450_v43 }
  0x85   : > { %689 = vmatprep.mubr.bf16.mxu0 %v1451_v44  ;;  %753 = vmatprep.mubr.bf16.mxu1 %v1453_v45 }
  0x8c   : > { %690 = vmatmul.mubr.bf16.gmra.mrb[28].mxu0 %v1455_v46  ;;  %754 = vmatmul.mubr.bf16.gmra.mrb[28].mxu1 %v1456_v47 }
 0x127   : > { %v1224_v48 = vpop.f32.mrb[0].mxu0  ;;  %v1272_v49 = vpop.f32.mrb[0].mxu1 }
 0x128   : > { %v1225_v51 = vpop.f32.mrb[1].mxu0  ;;  %v1273_v52 = vpop.f32.mrb[1].mxu1 }
 0x129   : > { %v1226_v53 = vadd.f32 %v1225_v51, %v1224_v48  ;;  %v1274_v54 = vadd.f32 %v1273_v52, %v1272_v49  ;;  %v1227_v55 = vpop.f32.mrb[2].mxu0  ;;  %v1275_v56 = vpop.f32.mrb[2].mxu1 }
 0x12a   : > { %v1228_v57 = vpop.f32.mrb[3].mxu0  ;;  %v1276_v58 = vpop.f32.mrb[3].mxu1 }
 0x12b   : > { %v636_v59 = vadd.f32 %v1226_v53, %v1749_v50  ;;  %v700_v60 = vadd.f32 %v1274_v54, %v1749_v50  ;;  %v1229_v61 = vadd.f32 %v1228_v57, %v1227_v55  ;;  %v1277_v62 = vadd.f32 %v1276_v58, %v1275_v56 }
 0x12d   : > { %v762_v63 = vmax.f32 %v636_v59, 0.0  ;;  %v778_v0 = vmax.f32 %v700_v60, 0.0  ;;  %v639_v1 = vadd.f32 %v1229_v61, %v1749_v50  ;;  %v703_v2 = vadd.f32 %v1277_v62, %v1749_v50 }
 0x12f   : > { %v1176_v3 = vpack.c.bf16 %v762_v63, %v762_v63  ;;  %v1192_v4 = vpack.c.bf16 %v778_v0, %v778_v0  ;;  %v763_v5 = vmax.f32 %v639_v1, 0.0  ;;  %v779_v6 = vmax.f32 %v703_v2, 0.0  ;;  %v1230_v7 = vpop.f32.mrb[4].mxu0  ;;  %v1278_v8 = vpop.f32.mrb[4].mxu1 }
 0x130   : > { %v1231_v9 = vpop.f32.mrb[5].mxu0  ;;  %v1279_v10 = vpop.f32.mrb[5].mxu1 }
 0x131   : > { %923 = vst.msk [vmem:[%s1758_s29] sm:$0xf] %vm922_vm0, %v1176_v3  ;;  %939 = vst.msk [vmem:[%s1758_s29 + $0x40] sm:$0xf] %vm922_vm0, %v1192_v4  ;;  %v1177_v11 = vpack.c.bf16 %v763_v5, %v763_v5  ;;  %v1193_v12 = vpack.c.bf16 %v779_v6, %v779_v6  ;;  %v1232_v13 = vadd.f32 %v1231_v9, %v1230_v7  ;;  %v1233_v15 = vpop.f32.mrb[6].mxu0  ;;  %v1281_v16 = vpop.f32.mrb[6].mxu1 }
 0x132   : > { %v1280_v14 = vadd.f32 %v1279_v10, %v1278_v8  ;;  %v1234_v17 = vpop.f32.mrb[7].mxu0  ;;  %v1282_v18 = vpop.f32.mrb[7].mxu1 }
 0x133   : > { %924 = vst.msk [vmem:[%s1758_s29 + $0x4] sm:$0xf] %vm922_vm0, %v1177_v11  ;;  %940 = vst.msk [vmem:[%s1758_s29 + $0x44] sm:$0xf] %vm922_vm0, %v1193_v12  ;;  %v644_v19 = vadd.f32 %v1232_v13, %v1749_v50  ;;  %v1235_v21 = vadd.f32 %v1234_v17, %v1233_v15  ;;  %v1283_v22 = vadd.f32 %v1282_v18, %v1281_v16 }
 0x134   : > { %v708_v20 = vadd.f32 %v1280_v14, %v1749_v50 }
 0x135   : > { %v764_v23 = vmax.f32 %v644_v19, 0.0  ;;  %v647_v25 = vadd.f32 %v1235_v21, %v1749_v50  ;;  %v711_v26 = vadd.f32 %v1283_v22, %v1749_v50 }
 0x136   : > { %v780_v24 = vmax.f32 %v708_v20, 0.0 }
 0x137   : > { %v1178_v27 = vpack.c.bf16 %v764_v23, %v764_v23  ;;  %v765_v29 = vmax.f32 %v647_v25, 0.0  ;;  %v781_v30 = vmax.f32 %v711_v26, 0.0  ;;  %v1236_v31 = vpop.f32.mrb[8].mxu0  ;;  %v1284_v32 = vpop.f32.mrb[8].mxu1 }
 0x138   : > { %v1194_v28 = vpack.c.bf16 %v780_v24, %v780_v24  ;;  %v1237_v33 = vpop.f32.mrb[9].mxu0  ;;  %v1285_v34 = vpop.f32.mrb[9].mxu1 }
 0x139   : > { %925 = vst.msk [vmem:[%s1758_s29 + $0x8] sm:$0xf] %vm922_vm0, %v1178_v27  ;;  %v1179_v35 = vpack.c.bf16 %v765_v29, %v765_v29  ;;  %v1195_v36 = vpack.c.bf16 %v781_v30, %v781_v30  ;;  %v1238_v37 = vadd.f32 %v1237_v33, %v1236_v31  ;;  %v1286_v38 = vadd.f32 %v1285_v34, %v1284_v32  ;;  %v1239_v39 = vpop.f32.mrb[10].mxu0  ;;  %v1287_v40 = vpop.f32.mrb[10].mxu1 }
 0x13a   : > { %941 = vst.msk [vmem:[%s1758_s29 + $0x48] sm:$0xf] %vm922_vm0, %v1194_v28  ;;  %v1240_v41 = vpop.f32.mrb[11].mxu0  ;;  %v1288_v42 = vpop.f32.mrb[11].mxu1 }
 0x13b   : > { %926 = vst.msk [vmem:[%s1758_s29 + $0xc] sm:$0xf] %vm922_vm0, %v1179_v35  ;;  %942 = vst.msk [vmem:[%s1758_s29 + $0x4c] sm:$0xf] %vm922_vm0, %v1195_v36  ;;  %v652_v43 = vadd.f32 %v1238_v37, %v1749_v50  ;;  %v716_v44 = vadd.f32 %v1286_v38, %v1749_v50  ;;  %v1241_v45 = vadd.f32 %v1240_v41, %v1239_v39 }
 0x13c   : > { %v1289_v46 = vadd.f32 %v1288_v42, %v1287_v40 }
 0x13d   : > { %v766_v47 = vmax.f32 %v652_v43, 0.0  ;;  %v782_v48 = vmax.f32 %v716_v44, 0.0  ;;  %v655_v49 = vadd.f32 %v1241_v45, %v1749_v50 }
 0x13e   : > { %v719_v51 = vadd.f32 %v1289_v46, %v1749_v50 }
 0x13f   : > { %v1180_v52 = vpack.c.bf16 %v766_v47, %v766_v47  ;;  %v1196_v53 = vpack.c.bf16 %v782_v48, %v782_v48  ;;  %v767_v54 = vmax.f32 %v655_v49, 0.0  ;;  %v1242_v56 = vpop.f32.mrb[12].mxu0  ;;  %v1290_v57 = vpop.f32.mrb[12].mxu1 }
 0x140   : > { %v783_v55 = vmax.f32 %v719_v51, 0.0  ;;  %v1243_v58 = vpop.f32.mrb[13].mxu0  ;;  %v1291_v59 = vpop.f32.mrb[13].mxu1 }
 0x141   : > { %927 = vst.msk [vmem:[%s1758_s29 + $0x10] sm:$0xf] %vm922_vm0, %v1180_v52  ;;  %943 = vst.msk [vmem:[%s1758_s29 + $0x50] sm:$0xf] %vm922_vm0, %v1196_v53  ;;  %v1181_v60 = vpack.c.bf16 %v767_v54, %v767_v54  ;;  %v1244_v62 = vadd.f32 %v1243_v58, %v1242_v56  ;;  %v1292_v63 = vadd.f32 %v1291_v59, %v1290_v57  ;;  %v1245_v0 = vpop.f32.mrb[14].mxu0  ;;  %v1293_v1 = vpop.f32.mrb[14].mxu1 }
 0x142   : > { %v1197_v61 = vpack.c.bf16 %v783_v55, %v783_v55  ;;  %v1246_v2 = vpop.f32.mrb[15].mxu0  ;;  %v1294_v3 = vpop.f32.mrb[15].mxu1 }
 0x143   : > { %928 = vst.msk [vmem:[%s1758_s29 + $0x14] sm:$0xf] %vm922_vm0, %v1181_v60  ;;  %v660_v4 = vadd.f32 %v1244_v62, %v1749_v50  ;;  %v724_v5 = vadd.f32 %v1292_v63, %v1749_v50  ;;  %v1247_v6 = vadd.f32 %v1246_v2, %v1245_v0  ;;  %v1295_v7 = vadd.f32 %v1294_v3, %v1293_v1 }
 0x144   : > { %944 = vst.msk [vmem:[%s1758_s29 + $0x54] sm:$0xf] %vm922_vm0, %v1197_v61 }
 0x145   : > { %v768_v8 = vmax.f32 %v660_v4, 0.0  ;;  %v784_v9 = vmax.f32 %v724_v5, 0.0  ;;  %v663_v10 = vadd.f32 %v1247_v6, %v1749_v50  ;;  %v727_v11 = vadd.f32 %v1295_v7, %v1749_v50 }
 0x147   : > { %v1182_v12 = vpack.c.bf16 %v768_v8, %v768_v8  ;;  %v1198_v13 = vpack.c.bf16 %v784_v9, %v784_v9  ;;  %v769_v14 = vmax.f32 %v663_v10, 0.0  ;;  %v785_v15 = vmax.f32 %v727_v11, 0.0  ;;  %v1248_v16 = vpop.f32.mrb[16].mxu0  ;;  %v1296_v17 = vpop.f32.mrb[16].mxu1 }
 0x148   : > { %v1249_v18 = vpop.f32.mrb[17].mxu0  ;;  %v1297_v19 = vpop.f32.mrb[17].mxu1 }
 0x149   : > { %929 = vst.msk [vmem:[%s1758_s29 + $0x18] sm:$0xf] %vm922_vm0, %v1182_v12  ;;  %945 = vst.msk [vmem:[%s1758_s29 + $0x58] sm:$0xf] %vm922_vm0, %v1198_v13  ;;  %v1183_v20 = vpack.c.bf16 %v769_v14, %v769_v14  ;;  %v1199_v21 = vpack.c.bf16 %v785_v15, %v785_v15  ;;  %v1250_v22 = vadd.f32 %v1249_v18, %v1248_v16  ;;  %v1251_v24 = vpop.f32.mrb[18].mxu0  ;;  %v1299_v25 = vpop.f32.mrb[18].mxu1 }
 0x14a   : > { %v1298_v23 = vadd.f32 %v1297_v19, %v1296_v17  ;;  %v1252_v26 = vpop.f32.mrb[19].mxu0  ;;  %v1300_v27 = vpop.f32.mrb[19].mxu1 }
 0x14b   : > { %930 = vst.msk [vmem:[%s1758_s29 + $0x1c] sm:$0xf] %vm922_vm0, %v1183_v20  ;;  %946 = vst.msk [vmem:[%s1758_s29 + $0x5c] sm:$0xf] %vm922_vm0, %v1199_v21  ;;  %v668_v28 = vadd.f32 %v1250_v22, %v1749_v50  ;;  %v1253_v30 = vadd.f32 %v1252_v26, %v1251_v24  ;;  %v1301_v31 = vadd.f32 %v1300_v27, %v1299_v25 }
 0x14c   : > { %v732_v29 = vadd.f32 %v1298_v23, %v1749_v50 }
 0x14d   : > { %v770_v32 = vmax.f32 %v668_v28, 0.0  ;;  %v671_v34 = vadd.f32 %v1253_v30, %v1749_v50  ;;  %v735_v35 = vadd.f32 %v1301_v31, %v1749_v50 }
 0x14e   : > { %v786_v33 = vmax.f32 %v732_v29, 0.0 }
 0x14f   : > { %v1184_v36 = vpack.c.bf16 %v770_v32, %v770_v32  ;;  %v771_v38 = vmax.f32 %v671_v34, 0.0  ;;  %v787_v39 = vmax.f32 %v735_v35, 0.0  ;;  %v1254_v40 = vpop.f32.mrb[20].mxu0  ;;  %v1302_v41 = vpop.f32.mrb[20].mxu1 }
 0x150   : > { %v1200_v37 = vpack.c.bf16 %v786_v33, %v786_v33  ;;  %v1255_v42 = vpop.f32.mrb[21].mxu0  ;;  %v1303_v43 = vpop.f32.mrb[21].mxu1 }
 0x151   : > { %931 = vst.msk [vmem:[%s1758_s29 + $0x20] sm:$0xf] %vm922_vm0, %v1184_v36  ;;  %v1185_v44 = vpack.c.bf16 %v771_v38, %v771_v38  ;;  %v1201_v45 = vpack.c.bf16 %v787_v39, %v787_v39  ;;  %v1256_v46 = vadd.f32 %v1255_v42, %v1254_v40  ;;  %v1304_v47 = vadd.f32 %v1303_v43, %v1302_v41  ;;  %v1257_v48 = vpop.f32.mrb[22].mxu0  ;;  %v1305_v49 = vpop.f32.mrb[22].mxu1 }
 0x152   : > { %947 = vst.msk [vmem:[%s1758_s29 + $0x60] sm:$0xf] %vm922_vm0, %v1200_v37  ;;  %v1258_v51 = vpop.f32.mrb[23].mxu0  ;;  %v1306_v52 = vpop.f32.mrb[23].mxu1 }
 0x153   : > { %932 = vst.msk [vmem:[%s1758_s29 + $0x24] sm:$0xf] %vm922_vm0, %v1185_v44  ;;  %948 = vst.msk [vmem:[%s1758_s29 + $0x64] sm:$0xf] %vm922_vm0, %v1201_v45  ;;  %v676_v53 = vadd.f32 %v1256_v46, %v1749_v50  ;;  %v740_v54 = vadd.f32 %v1304_v47, %v1749_v50  ;;  %v1259_v55 = vadd.f32 %v1258_v51, %v1257_v48 }
 0x154   : > { %v1307_v56 = vadd.f32 %v1306_v52, %v1305_v49 }
 0x155   : > { %v772_v57 = vmax.f32 %v676_v53, 0.0  ;;  %v788_v58 = vmax.f32 %v740_v54, 0.0  ;;  %v679_v59 = vadd.f32 %v1259_v55, %v1749_v50 }
 0x156   : > { %v743_v60 = vadd.f32 %v1307_v56, %v1749_v50 }
 0x157   : > { %v1186_v61 = vpack.c.bf16 %v772_v57, %v772_v57  ;;  %v1202_v62 = vpack.c.bf16 %v788_v58, %v788_v58  ;;  %v773_v63 = vmax.f32 %v679_v59, 0.0  ;;  %v1260_v1 = vpop.f32.mrb[24].mxu0  ;;  %v1308_v2 = vpop.f32.mrb[24].mxu1 }
 0x158   : > { %v789_v0 = vmax.f32 %v743_v60, 0.0  ;;  %v1261_v3 = vpop.f32.mrb[25].mxu0  ;;  %v1309_v4 = vpop.f32.mrb[25].mxu1 }
 0x159   : > { %933 = vst.msk [vmem:[%s1758_s29 + $0x28] sm:$0xf] %vm922_vm0, %v1186_v61  ;;  %949 = vst.msk [vmem:[%s1758_s29 + $0x68] sm:$0xf] %vm922_vm0, %v1202_v62  ;;  %v1187_v5 = vpack.c.bf16 %v773_v63, %v773_v63  ;;  %v1262_v7 = vadd.f32 %v1261_v3, %v1260_v1  ;;  %v1310_v8 = vadd.f32 %v1309_v4, %v1308_v2  ;;  %v1263_v9 = vpop.f32.mrb[26].mxu0  ;;  %v1311_v10 = vpop.f32.mrb[26].mxu1 }
 0x15a   : > { %v1203_v6 = vpack.c.bf16 %v789_v0, %v789_v0  ;;  %v1264_v11 = vpop.f32.mrb[27].mxu0  ;;  %v1312_v12 = vpop.f32.mrb[27].mxu1 }
 0x15b   : > { %934 = vst.msk [vmem:[%s1758_s29 + $0x2c] sm:$0xf] %vm922_vm0, %v1187_v5  ;;  %v684_v13 = vadd.f32 %v1262_v7, %v1749_v50  ;;  %v748_v14 = vadd.f32 %v1310_v8, %v1749_v50  ;;  %v1265_v15 = vadd.f32 %v1264_v11, %v1263_v9  ;;  %v1313_v16 = vadd.f32 %v1312_v12, %v1311_v10 }
 0x15c   : > { %950 = vst.msk [vmem:[%s1758_s29 + $0x6c] sm:$0xf] %vm922_vm0, %v1203_v6 }
 0x15d   : > { %v774_v17 = vmax.f32 %v684_v13, 0.0  ;;  %v790_v18 = vmax.f32 %v748_v14, 0.0  ;;  %v687_v19 = vadd.f32 %v1265_v15, %v1749_v50  ;;  %v751_v20 = vadd.f32 %v1313_v16, %v1749_v50 }
 0x15f   : > { %v1188_v21 = vpack.c.bf16 %v774_v17, %v774_v17  ;;  %v1204_v22 = vpack.c.bf16 %v790_v18, %v790_v18  ;;  %v775_v23 = vmax.f32 %v687_v19, 0.0  ;;  %v791_v24 = vmax.f32 %v751_v20, 0.0  ;;  %v1266_v25 = vpop.f32.mrb[28].mxu0  ;;  %v1314_v26 = vpop.f32.mrb[28].mxu1 }
 0x160   : > { %v1267_v27 = vpop.f32.mrb[29].mxu0  ;;  %v1315_v28 = vpop.f32.mrb[29].mxu1 }
 0x161   : > { %935 = vst.msk [vmem:[%s1758_s29 + $0x30] sm:$0xf] %vm922_vm0, %v1188_v21  ;;  %951 = vst.msk [vmem:[%s1758_s29 + $0x70] sm:$0xf] %vm922_vm0, %v1204_v22  ;;  %v1189_v29 = vpack.c.bf16 %v775_v23, %v775_v23  ;;  %v1205_v30 = vpack.c.bf16 %v791_v24, %v791_v24  ;;  %v1268_v31 = vadd.f32 %v1267_v27, %v1266_v25  ;;  %v1269_v33 = vpop.f32.mrb[30].mxu0  ;;  %v1317_v34 = vpop.f32.mrb[30].mxu1 }
 0x162   : > { %v1316_v32 = vadd.f32 %v1315_v28, %v1314_v26  ;;  %v1270_v35 = vpop.f32.mrb[31].mxu0  ;;  %v1318_v36 = vpop.f32.mrb[31].mxu1 }
 0x163   : > { %936 = vst.msk [vmem:[%s1758_s29 + $0x34] sm:$0xf] %vm922_vm0, %v1189_v29  ;;  %952 = vst.msk [vmem:[%s1758_s29 + $0x74] sm:$0xf] %vm922_vm0, %v1205_v30  ;;  %v692_v37 = vadd.f32 %v1268_v31, %v1749_v50  ;;  %v1271_v39 = vadd.f32 %v1270_v35, %v1269_v33  ;;  %v1319_v40 = vadd.f32 %v1318_v36, %v1317_v34 }
 0x164   : > { %v756_v38 = vadd.f32 %v1316_v32, %v1749_v50 }
 0x165   : > { %v776_v41 = vmax.f32 %v692_v37, 0.0  ;;  %v695_v43 = vadd.f32 %v1271_v39, %v1749_v50  ;;  %v759_v44 = vadd.f32 %v1319_v40, %v1749_v50 }
 0x166   : > { %v792_v42 = vmax.f32 %v756_v38, 0.0 }
 0x167   : > { %v1190_v45 = vpack.c.bf16 %v776_v41, %v776_v41  ;;  %v777_v47 = vmax.f32 %v695_v43, 0.0  ;;  %v793_v48 = vmax.f32 %v759_v44, 0.0 }
 0x168   : > { %v1206_v46 = vpack.c.bf16 %v792_v42, %v792_v42 }
 0x169   : > { %937 = vst.msk [vmem:[%s1758_s29 + $0x38] sm:$0xf] %vm922_vm0, %v1190_v45  ;;  %v1191_v49 = vpack.c.bf16 %v777_v47, %v777_v47  ;;  %v1207_v51 = vpack.c.bf16 %v793_v48, %v793_v48 }
 0x16a   : > { %953 = vst.msk [vmem:[%s1758_s29 + $0x78] sm:$0xf] %vm922_vm0, %v1206_v46 }
 0x16b   : > { %938 = vst.msk [vmem:[%s1758_s29 + $0x3c] sm:$0xf] %vm922_vm0, %v1191_v49  ;;  %954 = vst.msk [vmem:[%s1758_s29 + $0x7c] sm:$0xf] %vm922_vm0, %v1207_v51 }
 0x16c PF: > { %s16_s17 = sadd.s32 1, %s1537_s17   ;;  %s1877_s12 = smov %s1521_s13 }
 0x16d   : > { %p13_p9 = scmp.ge.s32.totalorder %s16_s17, 10   ;;  %s1878_s13 = smov %s1525_s14 }
 0x16e   : > { %s1879_s14 = smov %s1611_s24  ;;  %s1880_s15 = smov %s1533_s16 }
 0x16f   : > { %s1881_s16 = smov %s1883_s19  ;;  %15 = sbr.rel (!%p13_p9) target bundleno = 4 (0x4), region = 78 }
 0x176   :  { %983 = vsyncpa [#allocation3], 1 }
 0x177   :  { %985 = vsyncpa [#allocation3 + $0x1], 1 }

</bundles_post_ra>
